<compile_context>
chip_gen: v6e
topology: v6e:2x2x1
jax: 0.10.0
libtpu: 0.0.40
codegen_flags: <defaults>
</compile_context>

<pallas_src>
import functools
import itertools

import numpy as np
import jax
import jax.numpy as jnp
from jax.experimental import pallas as pl
from jax.experimental.pallas import tpu as pltpu

try:
    from scipy.optimize import linear_sum_assignment as _scipy_lsa
except Exception:  # pragma: no cover
    _scipy_lsa = None


# ----------------------------------------------------------------------------
# Pallas kernel: transposed cost matrix tile  C^T[M_pad, TILE_N]
# ----------------------------------------------------------------------------
# Augmented box slab layout (16 rows / cols):
#   0-5  : original cxcyczwhd          (L1 cost)
#   6-8  : lo = c - 0.5*clamp(w)       (GIoU)
#   9-11 : hi = c + 0.5*clamp(w)       (GIoU)
#   12-14: clamped w/h/d               (enclosing-box extent)
#   15   : volume                      (union)
def _cost_kernel(logits_t_ref, cls_w_ref, pbox_ref, tbox_ref, ct_ref,
                 *, w_bbox, w_giou):
    # ---- softmax numerator over classes (class axis = axis 0, lane-dense in N) ----
    logits_t = logits_t_ref[...].astype(jnp.float32)          # [C, TN]
    mx = jnp.max(logits_t, axis=0, keepdims=True)
    ex = jnp.exp(logits_t - mx)                                # [C, TN]
    inv_den = pl.reciprocal(jnp.sum(ex, axis=0, keepdims=True), approx=True)  # [1, TN]

    # ---- classification cost: normalization folded AFTER the MXU matmul ----
    # cls_w already holds (-w_class * class_matrix) in bf16.
    cost = jnp.dot(cls_w_ref[...], ex.astype(jnp.bfloat16),
                   preferred_element_type=jnp.float32) * inv_den       # [Mp, TN]

    pb = pbox_ref[...]                                         # [16, TN] f32
    tb = tbox_ref[...]                                         # [Mp, 16] f32

    def prow(k):   # [1, TN]  prediction slab row k (lane-dense)
        return pb[k:k + 1, :]

    def tcol(k):   # [Mp, 1]  target slab column k
        return tb[:, k:k + 1]

    # ---- L1 box cost (torch.cdist p=1) over the original 6 components ----
    l1 = jnp.abs(tcol(0) - prow(0))
    for k in range(1, 6):
        l1 = l1 + jnp.abs(tcol(k) - prow(k))

    # ---- GIoU-3D: raw overlap once per axis; enclosing extent = pw + tw - raw ----
    raw = jnp.minimum(tcol(9), prow(9)) - jnp.maximum(tcol(6), prow(6))
    inter = jnp.maximum(raw, 0.0)
    encl = (tcol(12) + prow(12)) - raw
    for a in (1, 2):
        raw = jnp.minimum(tcol(9 + a), prow(9 + a)) - jnp.maximum(tcol(6 + a), prow(6 + a))
        inter = inter * jnp.maximum(raw, 0.0)
        encl = encl * ((tcol(12 + a) + prow(12 + a)) - raw)

    union = tcol(15) + prow(15) - inter                        # vol_t + vol_p - inter

    # EUP reciprocals:  -giou = 1 - inter/union - union/encl
    r_u = pl.reciprocal(union, approx=True)
    r_e = pl.reciprocal(encl, approx=True)
    cost_giou = 1.0 - inter * r_u - union * r_e

    ct_ref[...] = cost + w_bbox * l1 + w_giou * cost_giou


# ----------------------------------------------------------------------------
# Host wrapper around pallas_call
# ----------------------------------------------------------------------------
def _round_up(x, m):
    return ((x + m - 1) // m) * m


_UNIT_BOX = np.array([0.5, 0.5, 0.5, 1.0, 1.0, 1.0], np.float32)  # well-conditioned pad


def _pad_rows(x, n_rows, fill_row=None):
    pad = n_rows - x.shape[0]
    if pad <= 0:
        return x
    if fill_row is None:
        return jnp.pad(x, ((0, pad), (0, 0)))
    fill = jnp.broadcast_to(jnp.asarray(fill_row, x.dtype), (pad, x.shape[1]))
    return jnp.concatenate([x, fill], axis=0)


def _augment_boxes(box):
    """[K, 6] cxcyczwhd (f32) -> [K, 16] slab: box | lo | hi | clamped whd | vol."""
    ctr = box[:, :3]
    whd = jnp.maximum(box[:, 3:], 1e-6)
    lo = ctr - 0.5 * whd
    hi = ctr + 0.5 * whd
    vol = (whd[:, 0] * whd[:, 1] * whd[:, 2])[:, None]
    return jnp.concatenate([box, lo, hi, whd, vol], axis=-1)


def cost_matrix_pallas(logits, cls_mat, pbox, tbox, *, w_class, w_bbox, w_giou):
    """logits [N,C], cls_mat [M,C] (positive map or one-hot), pbox [N,6], tbox [M,6]
    -> padded TRANSPOSED cost matrix [M_pad, N_pad] float32 (class + L1 + GIoU-3D)."""
    N, C = logits.shape
    M = cls_mat.shape[0]

    # Tile first, then pad N up to it.  Cap at 2048 (vreg live ranges, v5e scoped VMEM);
    # keep >= 2 parallel steps whenever possible so v7x megacore uses both TCs.
    N128 = _round_up(max(N, 1), 128)
    if N128 >= 256:
        TILE_N = min(2048, _round_up((N128 + 1) // 2, 128))
    else:
        TILE_N = N128
    N_pad = _round_up(N128, TILE_N)
    n_tiles = N_pad // TILE_N
    M_pad = _round_up(max(M, 1), 8)

    # Prediction-side operands: lane-dense transposed slabs.
    logits_t = _pad_rows(logits.astype(jnp.float32), N_pad).astype(jnp.bfloat16).T  # [C, N_pad] bf16
    pbox_aug = _augment_boxes(_pad_rows(pbox.astype(jnp.float32), N_pad, _UNIT_BOX)).T  # [16, N_pad] f32

    # Target-side operands: tiny, grid-resident.
    tbox_aug = _augment_boxes(_pad_rows(tbox.astype(jnp.float32), M_pad, _UNIT_BOX))    # [M_pad, 16]
    cls_w = _pad_rows((-float(w_class)) * cls_mat.astype(jnp.float32), M_pad)
    cls_w = cls_w.astype(jnp.bfloat16)                                                  # [M_pad, C]

    kernel = functools.partial(_cost_kernel, w_bbox=float(w_bbox), w_giou=float(w_giou))

    cost_est = pl.CostEstimate(
        flops=int(2 * M_pad * C * N_pad + 45 * M_pad * N_pad + 6 * C * N_pad),
        transcendentals=int(C * N_pad + N_pad + 2 * M_pad * N_pad),
        bytes_accessed=int(2 * C * N_pad + 4 * 16 * N_pad + 4 * M_pad * N_pad
                           + 4 * 16 * M_pad + 2 * M_pad * C),
    )

    ct = pl.pallas_call(
        kernel,
        out_shape=jax.ShapeDtypeStruct((M_pad, N_pad), jnp.float32),
        grid=(n_tiles,),
        in_specs=[
            pl.BlockSpec((C, TILE_N), lambda i: (0, i)),        # logits_t (tiled over N, bf16)
            pl.BlockSpec((M_pad, C), lambda i: (0, 0)),         # cls_w    (resident)
            pl.BlockSpec((16, TILE_N), lambda i: (0, i)),       # pbox_aug (tiled over N)
            pl.BlockSpec((M_pad, 16), lambda i: (0, 0)),        # tbox_aug (resident)
        ],
        out_specs=pl.BlockSpec((M_pad, TILE_N), lambda i: (0, i)),
        compiler_params=pltpu.CompilerParams(
            dimension_semantics=("parallel",),
            vmem_limit_bytes=32 * 1024 * 1024),
        cost_estimate=cost_est,
    )(logits_t, cls_w, pbox_aug, tbox_aug)

    return ct   # padded C^T; slice/transpose happens on the host


# ----------------------------------------------------------------------------
# Host-side glue (matcher wrapper + exact assignment)
# ----------------------------------------------------------------------------
def _linear_sum_assignment(cost):
    cost = np.asarray(cost, dtype=np.float64)
    if _scipy_lsa is not None:
        r, c = _scipy_lsa(cost)
        return np.asarray(r, np.int64), np.asarray(c, np.int64)
    # TODO(synk): Hungarian assignment has no Pallas equivalent; exact brute-force
    # fallback on host (only viable for small numbers of targets).
    n_r, n_c = cost.shape
    if n_r <= n_c:
        best_cost, best_cols = None, None
        rows = np.arange(n_r)
        for perm in itertools.permutations(range(n_c), n_r):
            total = cost[rows, list(perm)].sum()
            if best_cost is None or total < best_cost:
                best_cost, best_cols = total, np.array(perm)
        return rows.astype(np.int64), best_cols.astype(np.int64)
    cols, rows = _linear_sum_assignment(cost.T)
    order = np.argsort(rows)
    return rows[order].astype(np.int64), cols[order].astype(np.int64)


def hungarian_matcher_forward(outputs, targets, cost_class=1, cost_bbox=5,
                              cost_giou=2, soft_token=False):
    pred_logits = outputs['pred_logits']          # [bs, Q, C]
    pred_boxes = outputs['pred_boxes']            # [bs, Q, 6]
    bs, Q, C = pred_logits.shape
    N = bs * Q

    sizes = [int(t['boxes'].shape[0]) for t in targets]
    M = int(sum(sizes))
    if M == 0:   # zero-target guard: no kernel call on zero-width operands
        empty = (np.zeros((0,), np.int64), np.zeros((0,), np.int64))
        return [empty for _ in targets], np.zeros((N, 0), np.float32)

    logits_flat = pred_logits.reshape(N, C)
    pbox_flat = pred_boxes.reshape(N, 6)
    tgt_bbox = jnp.concatenate([t['boxes'] for t in targets], axis=0)

    if soft_token:
        pm = jnp.concatenate([t['positive_map'] for t in targets], axis=0)
        if pm.shape[-1] != C:
            pm = pm[..., :C]
        cls_mat = pm.astype(jnp.float32)                           # [M, C]
    else:
        # gather out_prob[:, tgt_ids] expressed as matmul with one-hot (exact)
        tgt_ids = jnp.concatenate([t['labels'] for t in targets], axis=0)
        cls_mat = jax.nn.one_hot(tgt_ids, C, dtype=jnp.float32)    # [M, C]

    ct_pad = cost_matrix_pallas(logits_flat, cls_mat, pbox_flat, tgt_bbox,
                                w_class=cost_class, w_bbox=cost_bbox, w_giou=cost_giou)
    ct_pad = jax.block_until_ready(ct_pad)

    # Slice + transpose on the host (the matrix is host-bound for assignment anyway).
    ct_np = np.asarray(jax.device_get(ct_pad))[:M, :N]             # [M, N]
    indices, col0 = [], 0
    for i, sz in enumerate(sizes):
        sub = ct_np[col0:col0 + sz, i * Q:(i + 1) * Q].T           # [Q, sz]
        indices.append(_linear_sum_assignment(sub))
        col0 += sz
    return indices, ct_np.T                                        # [N, M] numpy


# ----------------------------------------------------------------------------
# Pure-JAX reference (exact divides, f32) for verification of the cost matrix
# ----------------------------------------------------------------------------
def _cost_matrix_ref(logits, cls_mat, pbox, tbox, wc, wb, wg):
    prob = jax.nn.softmax(logits, axis=-1)
    cost_class = -(prob @ cls_mat.T)
    cost_bbox = jnp.abs(pbox[:, None, :] - tbox[None, :, :]).sum(-1)

    def to_xyz(b):
        c, s = b[:, :3], jnp.maximum(b[:, 3:], 1e-6)
        return jnp.concatenate([c - 0.5 * s, c + 0.5 * s], -1)

    b1, b2 = to_xyz(pbox), to_xyz(tbox)
    lo = jnp.maximum(b1[:, None, :3], b2[None, :, :3])
    hi = jnp.minimum(b1[:, None, 3:], b2[None, :, 3:])
    inter = jnp.prod(jnp.maximum(hi - lo, 0.0), -1)
    va = jnp.prod(b1[:, 3:] - b1[:, :3], -1)
    vb = jnp.prod(b2[:, 3:] - b2[:, :3], -1)
    union = va[:, None] + vb[None, :] - inter
    iou = inter / union
    elo = jnp.minimum(b1[:, None, :3], b2[None, :, :3])
    ehi = jnp.maximum(b1[:, None, 3:], b2[None, :, 3:])
    encl = jnp.prod(jnp.maximum(ehi - elo, 0.0), -1)
    giou = iou - (encl - union) / encl
    return wb * cost_bbox + wc * cost_class + wg * (-giou)


# ----------------------------------------------------------------------------
if __name__ == "__main__":
    key = jax.random.PRNGKey(0)
    bs, Q, num_classes = 2, 8, 32
    sizes = [3, 3]

    k1, k2, k3, k4 = jax.random.split(key, 4)
    pred_logits = jax.random.normal(k1, (bs, Q, num_classes), jnp.float32)
    p_ctr = jax.random.uniform(k2, (bs, Q, 3), minval=0.2, maxval=0.8)
    p_whd = jax.random.uniform(k3, (bs, Q, 3), minval=0.05, maxval=0.3)
    pred_boxes = jnp.concatenate([p_ctr, p_whd], axis=-1)

    targets = []
    tkeys = jax.random.split(k4, 3 * len(sizes))
    for i, m in enumerate(sizes):
        ka, kb, kc = tkeys[3 * i:3 * i + 3]
        t_ctr = jax.random.uniform(ka, (m, 3), minval=0.2, maxval=0.8)
        t_whd = jax.random.uniform(kb, (m, 3), minval=0.05, maxval=0.3)
        labels = jax.random.randint(kc, (m,), 0, num_classes)
        positive_map = jax.nn.one_hot(labels, 256, dtype=jnp.float32)  # [m, 256]
        targets.append({'boxes': jnp.concatenate([t_ctr, t_whd], axis=-1),
                        'labels': labels,
                        'positive_map': positive_map})

    outputs = {'pred_logits': pred_logits, 'pred_boxes': pred_boxes}

    logits_flat = pred_logits.reshape(bs * Q, num_classes)
    pbox_flat = pred_boxes.reshape(bs * Q, 6)
    tbox_all = jnp.concatenate([t['boxes'] for t in targets], 0)

    # Tolerance is loosened vs. the exact-divide f32 reference because the kernel uses
    # bf16 logits + a bf16 MXU class matmul and EUP approximate reciprocals
    # (softmax denominator, 1/union, 1/encl) per the performance guidance.
    TOL = 5e-2

    # --- soft-token path ---
    indices, C_pallas = hungarian_matcher_forward(
        outputs, targets, cost_class=1, cost_bbox=5, cost_giou=2, soft_token=True)
    pm_all = jnp.concatenate([t['positive_map'] for t in targets], 0)[:, :num_classes]
    C_ref = _cost_matrix_ref(logits_flat, pm_all, pbox_flat, tbox_all, 1.0, 5.0, 2.0)
    err = float(np.max(np.abs(np.asarray(C_pallas) - np.asarray(C_ref))))
    assert np.allclose(np.asarray(C_pallas), np.asarray(C_ref), atol=TOL, rtol=TOL), err
    assert len(indices) == bs
    for (ri, ci), sz in zip(indices, sizes):
        assert len(ri) == len(ci) == min(Q, sz)

    # --- hard-label path ---
    indices_h, C_pallas_h = hungarian_matcher_forward(
        outputs, targets, cost_class=1, cost_bbox=5, cost_giou=2, soft_token=False)
    tgt_ids = jnp.concatenate([t['labels'] for t in targets], 0)
    onehot = jax.nn.one_hot(tgt_ids, num_classes, dtype=jnp.float32)
    C_ref_h = _cost_matrix_ref(logits_flat, onehot, pbox_flat, tbox_all, 1.0, 5.0, 2.0)
    err_h = float(np.max(np.abs(np.asarray(C_pallas_h) - np.asarray(C_ref_h))))
    assert np.allclose(np.asarray(C_pallas_h), np.asarray(C_ref_h), atol=TOL, rtol=TOL), err_h
    assert len(indices_h) == bs
    for (ri, ci), sz in zip(indices_h, sizes):
        assert len(ri) == len(ci) == min(Q, sz)

    print("KERNEL_OK")
</pallas_src>

<mosaic_0001>
module attributes {stable_mosaic.version = 11 : i64} {
  func.func @_cost_kernel(%arg0: i32, %arg1: memref<32x128xbf16, #tpu.memory_space<vmem>>, %arg2: memref<8x32xbf16, #tpu.memory_space<vmem>>, %arg3: memref<16x128xf32, #tpu.memory_space<vmem>>, %arg4: memref<8x16xf32, #tpu.memory_space<vmem>>, %arg5: memref<8x128xf32, #tpu.memory_space<vmem>>) attributes {dimension_semantics = [#tpu.dimension_semantics<parallel>], iteration_bounds = array<i64: 1>, scalar_prefetch = 0 : i64, scratch_operands = 0 : i64, tpu.core_type = #tpu.core_type<tc>, window_params = [{transform_indices = @transform_0, window_bounds = array<i64: 32, 128>}, {pipeline_mode = #tpu.pipeline_mode<synchronous>, transform_indices = @transform_1, window_bounds = array<i64: 8, 32>}, {transform_indices = @transform_2, window_bounds = array<i64: 16, 128>}, {pipeline_mode = #tpu.pipeline_mode<synchronous>, transform_indices = @transform_3, window_bounds = array<i64: 8, 16>}, {transform_indices = @transform_4, window_bounds = array<i64: 8, 128>}]} {
    %c0 = arith.constant 0 : index
    %c0_0 = arith.constant 0 : index
    %0 = vector.load %arg1[%c0, %c0_0] : memref<32x128xbf16, #tpu.memory_space<vmem>>, vector<32x128xbf16>
    %1 = arith.extf %0 : vector<32x128xbf16> to vector<32x128xf32>
    %cst = arith.constant dense<0xFF800000> : vector<128xf32>
    %2 = vector.multi_reduction <maximumf>, %1, %cst [0] : vector<32x128xf32> to vector<128xf32>
    %3 = vector.shape_cast %2 : vector<128xf32> to vector<1x128xf32>
    %4 = vector.broadcast %3 : vector<1x128xf32> to vector<32x128xf32>
    %5 = arith.subf %1, %4 : vector<32x128xf32>
    %6 = math.exp %5 : vector<32x128xf32>
    %cst_1 = arith.constant dense<0.000000e+00> : vector<128xf32>
    %7 = vector.multi_reduction <add>, %6, %cst_1 [0] : vector<32x128xf32> to vector<128xf32>
    %8 = vector.shape_cast %7 : vector<128xf32> to vector<1x128xf32>
    %9 = tpu.reciprocal %8 {approx = true} : vector<1x128xf32> -> vector<1x128xf32>
    %c0_2 = arith.constant 0 : index
    %c0_3 = arith.constant 0 : index
    %10 = vector.load %arg2[%c0_2, %c0_3] : memref<8x32xbf16, #tpu.memory_space<vmem>>, vector<8x32xbf16>
    %11 = arith.truncf %6 : vector<32x128xf32> to vector<32x128xbf16>
    %cst_4 = arith.constant dense<0.000000e+00> : vector<8x128xf32>
    %12 = tpu.matmul %10, %11, %cst_4 {dimension_numbers = #tpu.dot_dimension_numbers<[1], [0], [0], [1], [0, 0, 1, 1], [], []>} : vector<8x32xbf16>, vector<32x128xbf16>, vector<8x128xf32> -> vector<8x128xf32>
    %13 = vector.broadcast %9 : vector<1x128xf32> to vector<8x128xf32>
    %14 = arith.mulf %12, %13 : vector<8x128xf32>
    %c0_5 = arith.constant 0 : index
    %c0_6 = arith.constant 0 : index
    %15 = vector.load %arg3[%c0_5, %c0_6] : memref<16x128xf32, #tpu.memory_space<vmem>>, vector<16x128xf32>
    %c0_7 = arith.constant 0 : index
    %c0_8 = arith.constant 0 : index
    %16 = vector.load %arg4[%c0_7, %c0_8] : memref<8x16xf32, #tpu.memory_space<vmem>>, vector<8x16xf32>
    %17 = vector.extract_strided_slice %16 {offsets = [0, 0], sizes = [8, 1], strides = [1, 1]} : vector<8x16xf32> to vector<8x1xf32>
    %18 = vector.extract_strided_slice %15 {offsets = [0, 0], sizes = [1, 128], strides = [1, 1]} : vector<16x128xf32> to vector<1x128xf32>
    %19 = vector.broadcast %17 : vector<8x1xf32> to vector<8x128xf32>
    %20 = vector.broadcast %18 : vector<1x128xf32> to vector<8x128xf32>
    %21 = arith.subf %19, %20 : vector<8x128xf32>
    %22 = math.absf %21 : vector<8x128xf32>
    %23 = vector.extract_strided_slice %16 {offsets = [0, 1], sizes = [8, 1], strides = [1, 1]} : vector<8x16xf32> to vector<8x1xf32>
    %24 = vector.extract_strided_slice %15 {offsets = [1, 0], sizes = [1, 128], strides = [1, 1]} : vector<16x128xf32> to vector<1x128xf32>
    %25 = vector.broadcast %23 : vector<8x1xf32> to vector<8x128xf32>
    %26 = vector.broadcast %24 : vector<1x128xf32> to vector<8x128xf32>
    %27 = arith.subf %25, %26 : vector<8x128xf32>
    %28 = math.absf %27 : vector<8x128xf32>
    %29 = arith.addf %22, %28 : vector<8x128xf32>
    %30 = vector.extract_strided_slice %16 {offsets = [0, 2], sizes = [8, 1], strides = [1, 1]} : vector<8x16xf32> to vector<8x1xf32>
    %31 = vector.extract_strided_slice %15 {offsets = [2, 0], sizes = [1, 128], strides = [1, 1]} : vector<16x128xf32> to vector<1x128xf32>
    %32 = vector.broadcast %30 : vector<8x1xf32> to vector<8x128xf32>
    %33 = vector.broadcast %31 : vector<1x128xf32> to vector<8x128xf32>
    %34 = arith.subf %32, %33 : vector<8x128xf32>
    %35 = math.absf %34 : vector<8x128xf32>
    %36 = arith.addf %29, %35 : vector<8x128xf32>
    %37 = vector.extract_strided_slice %16 {offsets = [0, 3], sizes = [8, 1], strides = [1, 1]} : vector<8x16xf32> to vector<8x1xf32>
    %38 = vector.extract_strided_slice %15 {offsets = [3, 0], sizes = [1, 128], strides = [1, 1]} : vector<16x128xf32> to vector<1x128xf32>
    %39 = vector.broadcast %37 : vector<8x1xf32> to vector<8x128xf32>
    %40 = vector.broadcast %38 : vector<1x128xf32> to vector<8x128xf32>
    %41 = arith.subf %39, %40 : vector<8x128xf32>
    %42 = math.absf %41 : vector<8x128xf32>
    %43 = arith.addf %36, %42 : vector<8x128xf32>
    %44 = vector.extract_strided_slice %16 {offsets = [0, 4], sizes = [8, 1], strides = [1, 1]} : vector<8x16xf32> to vector<8x1xf32>
    %45 = vector.extract_strided_slice %15 {offsets = [4, 0], sizes = [1, 128], strides = [1, 1]} : vector<16x128xf32> to vector<1x128xf32>
    %46 = vector.broadcast %44 : vector<8x1xf32> to vector<8x128xf32>
    %47 = vector.broadcast %45 : vector<1x128xf32> to vector<8x128xf32>
    %48 = arith.subf %46, %47 : vector<8x128xf32>
    %49 = math.absf %48 : vector<8x128xf32>
    %50 = arith.addf %43, %49 : vector<8x128xf32>
    %51 = vector.extract_strided_slice %16 {offsets = [0, 5], sizes = [8, 1], strides = [1, 1]} : vector<8x16xf32> to vector<8x1xf32>
    %52 = vector.extract_strided_slice %15 {offsets = [5, 0], sizes = [1, 128], strides = [1, 1]} : vector<16x128xf32> to vector<1x128xf32>
    %53 = vector.broadcast %51 : vector<8x1xf32> to vector<8x128xf32>
    %54 = vector.broadcast %52 : vector<1x128xf32> to vector<8x128xf32>
    %55 = arith.subf %53, %54 : vector<8x128xf32>
    %56 = math.absf %55 : vector<8x128xf32>
    %57 = arith.addf %50, %56 : vector<8x128xf32>
    %58 = vector.extract_strided_slice %16 {offsets = [0, 9], sizes = [8, 1], strides = [1, 1]} : vector<8x16xf32> to vector<8x1xf32>
    %59 = vector.extract_strided_slice %15 {offsets = [9, 0], sizes = [1, 128], strides = [1, 1]} : vector<16x128xf32> to vector<1x128xf32>
    %60 = vector.broadcast %58 : vector<8x1xf32> to vector<8x128xf32>
    %61 = vector.broadcast %59 : vector<1x128xf32> to vector<8x128xf32>
    %62 = arith.minimumf %60, %61 : vector<8x128xf32>
    %63 = vector.extract_strided_slice %16 {offsets = [0, 6], sizes = [8, 1], strides = [1, 1]} : vector<8x16xf32> to vector<8x1xf32>
    %64 = vector.extract_strided_slice %15 {offsets = [6, 0], sizes = [1, 128], strides = [1, 1]} : vector<16x128xf32> to vector<1x128xf32>
    %65 = vector.broadcast %63 : vector<8x1xf32> to vector<8x128xf32>
    %66 = vector.broadcast %64 : vector<1x128xf32> to vector<8x128xf32>
    %67 = arith.maximumf %65, %66 : vector<8x128xf32>
    %68 = arith.subf %62, %67 : vector<8x128xf32>
    %cst_9 = arith.constant 0.000000e+00 : f32
    %69 = vector.broadcast %cst_9 : f32 to vector<8x128xf32>
    %70 = arith.maximumf %68, %69 : vector<8x128xf32>
    %71 = vector.extract_strided_slice %16 {offsets = [0, 12], sizes = [8, 1], strides = [1, 1]} : vector<8x16xf32> to vector<8x1xf32>
    %72 = vector.extract_strided_slice %15 {offsets = [12, 0], sizes = [1, 128], strides = [1, 1]} : vector<16x128xf32> to vector<1x128xf32>
    %73 = vector.broadcast %71 : vector<8x1xf32> to vector<8x128xf32>
    %74 = vector.broadcast %72 : vector<1x128xf32> to vector<8x128xf32>
    %75 = arith.addf %73, %74 : vector<8x128xf32>
    %76 = arith.subf %75, %68 : vector<8x128xf32>
    %77 = vector.extract_strided_slice %16 {offsets = [0, 10], sizes = [8, 1], strides = [1, 1]} : vector<8x16xf32> to vector<8x1xf32>
    %78 = vector.extract_strided_slice %15 {offsets = [10, 0], sizes = [1, 128], strides = [1, 1]} : vector<16x128xf32> to vector<1x128xf32>
    %79 = vector.broadcast %77 : vector<8x1xf32> to vector<8x128xf32>
    %80 = vector.broadcast %78 : vector<1x128xf32> to vector<8x128xf32>
    %81 = arith.minimumf %79, %80 : vector<8x128xf32>
    %82 = vector.extract_strided_slice %16 {offsets = [0, 7], sizes = [8, 1], strides = [1, 1]} : vector<8x16xf32> to vector<8x1xf32>
    %83 = vector.extract_strided_slice %15 {offsets = [7, 0], sizes = [1, 128], strides = [1, 1]} : vector<16x128xf32> to vector<1x128xf32>
    %84 = vector.broadcast %82 : vector<8x1xf32> to vector<8x128xf32>
    %85 = vector.broadcast %83 : vector<1x128xf32> to vector<8x128xf32>
    %86 = arith.maximumf %84, %85 : vector<8x128xf32>
    %87 = arith.subf %81, %86 : vector<8x128xf32>
    %cst_10 = arith.constant 0.000000e+00 : f32
    %88 = vector.broadcast %cst_10 : f32 to vector<8x128xf32>
    %89 = arith.maximumf %87, %88 : vector<8x128xf32>
    %90 = arith.mulf %70, %89 : vector<8x128xf32>
    %91 = vector.extract_strided_slice %16 {offsets = [0, 13], sizes = [8, 1], strides = [1, 1]} : vector<8x16xf32> to vector<8x1xf32>
    %92 = vector.extract_strided_slice %15 {offsets = [13, 0], sizes = [1, 128], strides = [1, 1]} : vector<16x128xf32> to vector<1x128xf32>
    %93 = vector.broadcast %91 : vector<8x1xf32> to vector<8x128xf32>
    %94 = vector.broadcast %92 : vector<1x128xf32> to vector<8x128xf32>
    %95 = arith.addf %93, %94 : vector<8x128xf32>
    %96 = arith.subf %95, %87 : vector<8x128xf32>
    %97 = arith.mulf %76, %96 : vector<8x128xf32>
    %98 = vector.extract_strided_slice %16 {offsets = [0, 11], sizes = [8, 1], strides = [1, 1]} : vector<8x16xf32> to vector<8x1xf32>
    %99 = vector.extract_strided_slice %15 {offsets = [11, 0], sizes = [1, 128], strides = [1, 1]} : vector<16x128xf32> to vector<1x128xf32>
    %100 = vector.broadcast %98 : vector<8x1xf32> to vector<8x128xf32>
    %101 = vector.broadcast %99 : vector<1x128xf32> to vector<8x128xf32>
    %102 = arith.minimumf %100, %101 : vector<8x128xf32>
    %103 = vector.extract_strided_slice %16 {offsets = [0, 8], sizes = [8, 1], strides = [1, 1]} : vector<8x16xf32> to vector<8x1xf32>
    %104 = vector.extract_strided_slice %15 {offsets = [8, 0], sizes = [1, 128], strides = [1, 1]} : vector<16x128xf32> to vector<1x128xf32>
    %105 = vector.broadcast %103 : vector<8x1xf32> to vector<8x128xf32>
    %106 = vector.broadcast %104 : vector<1x128xf32> to vector<8x128xf32>
    %107 = arith.maximumf %105, %106 : vector<8x128xf32>
    %108 = arith.subf %102, %107 : vector<8x128xf32>
    %cst_11 = arith.constant 0.000000e+00 : f32
    %109 = vector.broadcast %cst_11 : f32 to vector<8x128xf32>
    %110 = arith.maximumf %108, %109 : vector<8x128xf32>
    %111 = arith.mulf %90, %110 : vector<8x128xf32>
    %112 = vector.extract_strided_slice %16 {offsets = [0, 14], sizes = [8, 1], strides = [1, 1]} : vector<8x16xf32> to vector<8x1xf32>
    %113 = vector.extract_strided_slice %15 {offsets = [14, 0], sizes = [1, 128], strides = [1, 1]} : vector<16x128xf32> to vector<1x128xf32>
    %114 = vector.broadcast %112 : vector<8x1xf32> to vector<8x128xf32>
    %115 = vector.broadcast %113 : vector<1x128xf32> to vector<8x128xf32>
    %116 = arith.addf %114, %115 : vector<8x128xf32>
    %117 = arith.subf %116, %108 : vector<8x128xf32>
    %118 = arith.mulf %97, %117 : vector<8x128xf32>
    %119 = vector.extract_strided_slice %16 {offsets = [0, 15], sizes = [8, 1], strides = [1, 1]} : vector<8x16xf32> to vector<8x1xf32>
    %120 = vector.extract_strided_slice %15 {offsets = [15, 0], sizes = [1, 128], strides = [1, 1]} : vector<16x128xf32> to vector<1x128xf32>
    %121 = vector.broadcast %119 : vector<8x1xf32> to vector<8x128xf32>
    %122 = vector.broadcast %120 : vector<1x128xf32> to vector<8x128xf32>
    %123 = arith.addf %121, %122 : vector<8x128xf32>
    %124 = arith.subf %123, %111 : vector<8x128xf32>
    %125 = tpu.reciprocal %124 {approx = true} : vector<8x128xf32> -> vector<8x128xf32>
    %126 = tpu.reciprocal %118 {approx = true} : vector<8x128xf32> -> vector<8x128xf32>
    %127 = arith.mulf %111, %125 : vector<8x128xf32>
    %cst_12 = arith.constant 1.000000e+00 : f32
    %128 = vector.broadcast %cst_12 : f32 to vector<8x128xf32>
    %129 = arith.subf %128, %127 : vector<8x128xf32>
    %130 = arith.mulf %124, %126 : vector<8x128xf32>
    %131 = arith.subf %129, %130 : vector<8x128xf32>
    %cst_13 = arith.constant 5.000000e+00 : f32
    %132 = vector.broadcast %cst_13 : f32 to vector<8x128xf32>
    %133 = arith.mulf %132, %57 : vector<8x128xf32>
    %134 = arith.addf %14, %133 : vector<8x128xf32>
    %cst_14 = arith.constant 2.000000e+00 : f32
    %135 = vector.broadcast %cst_14 : f32 to vector<8x128xf32>
    %136 = arith.mulf %135, %131 : vector<8x128xf32>
    %137 = arith.addf %134, %136 : vector<8x128xf32>
    %c0_15 = arith.constant 0 : index
    %c0_16 = arith.constant 0 : index
    %138 = vector.load %arg5[%c0_15, %c0_16] : memref<8x128xf32, #tpu.memory_space<vmem>>, vector<8x128xf32>
    tpu.vector_store %arg5[%c0_15, %c0_16], %137 {strides = array<i32>} : memref<8x128xf32, #tpu.memory_space<vmem>>, vector<8x128xf32>,
    return
  }
  func.func @transform_0(%arg0: i32) -> (i32, i32) {
    %c0_i32 = arith.constant 0 : i32
    %c0_i32_0 = arith.constant 0 : i32
    return %c0_i32, %arg0 : i32, i32
  }
  func.func @transform_1(%arg0: i32) -> (i32, i32) {
    %c0_i32 = arith.constant 0 : i32
    %c0_i32_0 = arith.constant 0 : i32
    %c0_i32_1 = arith.constant 0 : i32
    return %c0_i32, %c0_i32_0 : i32, i32
  }
  func.func @transform_2(%arg0: i32) -> (i32, i32) {
    %c0_i32 = arith.constant 0 : i32
    %c0_i32_0 = arith.constant 0 : i32
    return %c0_i32, %arg0 : i32, i32
  }
  func.func @transform_3(%arg0: i32) -> (i32, i32) {
    %c0_i32 = arith.constant 0 : i32
    %c0_i32_0 = arith.constant 0 : i32
    %c0_i32_1 = arith.constant 0 : i32
    return %c0_i32, %c0_i32_0 : i32, i32
  }
  func.func @transform_4(%arg0: i32) -> (i32, i32) {
    %c0_i32 = arith.constant 0 : i32
    %c0_i32_0 = arith.constant 0 : i32
    return %c0_i32, %arg0 : i32, i32
  }
}

</mosaic_0001>

<bundles_post_ra>
// kernel: tpu_custom_call.1
= control target key start
LH: loop header
LB: loop body
LE: loop exit
PB: predicated region body
PF: predicated region fallthrough
CT: control target
= control target key end

     0   :  { %9 = vsyncpa [#allocation3], 0  ;;  %s653_s0 = inlined_call_operand.hbm [shape: bf16[32,128], index: 0, kind: input, shape index: {}]   ;;  %s654_s1 = inlined_call_operand.hbm [shape: bf16[8,32], index: 1, kind: input, shape index: {}]   ;;  %s655_s2 = inlined_call_operand.hbm [shape: f32[16,128], index: 2, kind: input, shape index: {}]   ;;  %s656_s3 = inlined_call_operand.hbm [shape: f32[8,16], index: 3, kind: input, shape index: {}]   ;;  %s657_s4 = inlined_call_operand.hbm [shape: f32[8,128], index: 4, kind: output, shape index: {}]  }
   0x1   :  { %10 = vsyncpa [#allocation6], 0 }
   0x2   :  { %11 = vsyncpa [#allocation9], 0 }
   0x3   :  { %12 = vsyncpa [#allocation4], 0  ;;  %s545_s15 = smov [#allocation5]   ;;  %s546_s17 = smov [#allocation2]  }
   0x4   :  { %s31_s16 = sshll.u32 %s545_s15, 4  ;;  %s18_s18 = sshll.u32 %s546_s17, 4  ;;  %s32_s16 = int_to_ptr.vmem [resolvable:$true] %s31_s16  ;;  %s19_s18 = int_to_ptr.vmem [resolvable:$true] %s18_s18 }
   0x5   :  { %s445_s19 = scalar_lea.vmem %s32_s16, 64  ;;  %p450_p1 = scmp.lt.s32.totalorder %s32_s16, %s32_s16 }
   0x6   :  { %p446_p0 = scmp.ne.s32.totalorder %s32_s16, %s445_s19  ;;  %p451_p2 = scmp.lt.s32.totalorder %s445_s19, %s445_s19 }
   0x8   :  { %p452_p3 = por %p451_p2, %p450_p1 }
   0xa   :  { %p453_p4 = pnand %p452_p3, %p446_p0 }
   0xc   :  { %456 = shalt.err (!%p453_p4)
}
   0xd   :  { %34 = dma.hbm_to_vmem [thread:$0]  %s654_s1, 64, %s32_s16, [#allocation6]  }
   0xe   :  { %s465_s22 = scalar_lea.vmem %s19_s18, 256  ;;  %p470_p6 = scmp.lt.s32.totalorder %s19_s18, %s19_s18 }
   0xf   :  { %p466_p5 = scmp.ne.s32.totalorder %s19_s18, %s465_s22  ;;  %p471_p7 = scmp.lt.s32.totalorder %s465_s22, %s465_s22 }
  0x11   :  { %p472_p8 = por %p471_p7, %p470_p6 }
  0x13   :  { %p473_p9 = pnand %p472_p8, %p466_p5 }
  0x15   :  { %476 = shalt.err (!%p473_p9)
}
  0x16   :  { %s547_s23 = smov 64   ;;  %s548_s24 = smov 4  }
  0x17   :  { %24 = dma.hbm_to_vmem [thread:$0]  %s653_s0, 256, %s19_s18, [#allocation3], %s547_s23, %s547_s23, %s548_s24  }
  0x18   :  { %s549_s27 = smov [#allocation7]  }
  0x19   :  { %s40_s28 = sshll.u32 %s549_s27, 4  ;;  %s41_s28 = int_to_ptr.vmem [resolvable:$true] %s40_s28 }
  0x1a   :  { %s485_s29 = scalar_lea.vmem %s41_s28, 256  ;;  %p490_p11 = scmp.lt.s32.totalorder %s41_s28, %s41_s28 }
  0x1b   :  { %p486_p10 = scmp.ne.s32.totalorder %s41_s28, %s485_s29  ;;  %p491_p12 = scmp.lt.s32.totalorder %s485_s29, %s485_s29 }
  0x1d   :  { %p492_p13 = por %p491_p12, %p490_p11 }
  0x1f   :  { %p493_p0 = pnand %p492_p13, %p486_p10 }
  0x21   :  { %496 = shalt.err (!%p493_p0)
}
  0x22   :  { %s550_s1 = smov 128   ;;  %s551_s30 = smov 8  }
  0x23   :  { %46 = dma.hbm_to_vmem [thread:$0]  %s655_s2, 256, %s41_s28, [#allocation6], %s550_s1, %s550_s1, %s551_s30  }
  0x24   :  { %s552_s7 = smov [#allocation8]  }
  0x25   :  { %s53_s8 = sshll.u32 %s552_s7, 4  ;;  %s54_s8 = int_to_ptr.vmem [resolvable:$true] %s53_s8 }
  0x26   :  { %s505_s0 = scalar_lea.vmem %s54_s8, 128  ;;  %p510_p2 = scmp.lt.s32.totalorder %s54_s8, %s54_s8 }
  0x27   :  { %p506_p1 = scmp.ne.s32.totalorder %s54_s8, %s505_s0  ;;  %p511_p3 = scmp.lt.s32.totalorder %s505_s0, %s505_s0 }
  0x29   :  { %p512_p4 = por %p511_p3, %p510_p2 }
  0x2b   :  { %p513_p5 = pnand %p512_p4, %p506_p1 }
  0x2d   :  { %516 = shalt.err (!%p513_p5)
}
  0x2e   :  { %56 = dma.hbm_to_vmem [thread:$0]  %s656_s3, 128, %s54_s8, [#allocation9]  }
  0x2f   :  { %537 = dma.done.wait [#allocation3], 256  }
  0x30   :  { %538 = vsyncadd [#allocation3], 4294967040 }
  0x31   :  { %539 = dma.done.wait [#allocation6], 320  }
  0x32   :  { %540 = vsyncadd [#allocation6], 4294966976 }
  0x33   :  { %541 = dma.done.wait [#allocation9], 128  }
  0x34   :  { %542 = vsyncadd [#allocation9], 4294967168  ;;  %v553_v0 = vmov 10   ;;  %v554_v1 = vmov 0.0   ;;  %v555_v2 = vmov 9   ;;  %vm556_vm0 = vmmov 0  }
  0x35   :  { %408 = vset.pattern.permute.xlu1 %v553_v0  ;;  %371 = vmatprep.subr.bf16.mxu0 %v554_v1  ;;  %v611_v3 = vld [vmem:[#allocation8] sm:$0xff]  ;;  %v557_v12 = vmov 7   ;;  %v558_v14 = vmov 6   ;;  %v559_v17 = vmov 11   ;;  %v560_v18 = vmov 8   ;;  %v158_v60 = vld [vmem:[#allocation7 + $0x8] sm:$0xff] }
  0x36   :  { %406 = vset.pattern.permute.xlu0 %v555_v2  ;;  %375 = vmatprep.mubr.msk.bf16.mxu0 %vm556_vm0, %v554_v1  ;;  %v360_v4 = vld [vmem:[#allocation2] sm:$0xff]   ;;  %v367_v5 = vld [vmem:[#allocation2 + $0x8] sm:$0xff]   ;;  %v561_v22 = vmov 12   ;;  %v562_v23 = vmov 14   ;;  %v563_v29 = vmov 13   ;;  %v564_v30 = vmov 1  }
  0x37   :  { %257 = vperm.xlu1 %408, %v611_v3   ;;  %v361_v6 = vunpack.c.l.bf16 %v360_v4  ;;  %v362_v7 = vunpack.c.h.bf16 %v360_v4  ;;  %v365_v8 = vunpack.c.l.bf16 %v367_v5  ;;  %v366_v9 = vunpack.c.h.bf16 %v367_v5  ;;  %227 = vperm.xlu0 %406, %v611_v3   ;;  %v109_v46 = vld [vmem:[#allocation5] sm:$0xf]  ;;  %v636_v61 = vld [vmem:[#allocation7] sm:$0xff]  ;;  %s571_s2 = smov [#allocation10]  }
  0x38   :  { %v565_v35 = vmov 15   ;;  %v566_v36 = vmov 4   ;;  %v567_v37 = vmov 0   ;;  %v568_v38 = vmov 2   ;;  %s347_s3 = sshll.u32 %s571_s2, 4  ;;  %s348_s3 = int_to_ptr.vmem [resolvable:$true] %s347_s3 }
  0x39   :  { %v78_v10 = vmax.f32 %v361_v6, %v362_v7  ;;  %v79_v11 = vmax.f32 %v365_v8, %v366_v9  ;;  %v569_v45 = vmov 3   ;;  %vm112_vm1 = vcmask 261120   ;;  %s517_s11 = scalar_lea.vmem %s348_s3, 128  ;;  %p522_p7 = scmp.lt.s32.totalorder %s348_s3, %s348_s3 }
  0x3a   :  { %v570_v47 = vmov 5   ;;  %v165_v52 = vlaneseq  ;;  %p518_p6 = scmp.ne.s32.totalorder %s348_s3, %s517_s11  ;;  %p523_p8 = scmp.lt.s32.totalorder %s517_s11, %s517_s11 }
  0x3b   :  { %409 = vset.pattern.permute.xlu1 %v557_v12  ;;  %v80_v13 = vmax.f32 %v78_v10, %v79_v11  ;;  %407 = vset.pattern.permute.xlu0 %v558_v14 }
  0x3c   :  { %266 = vperm.xlu1 %409, %v611_v3   ;;  %236 = vperm.xlu0 %407, %v611_v3   ;;  %v630_v54 = vshrl.u32 %v165_v52, 7  ;;  %p524_p9 = por %p523_p8, %p522_p7 }
  0x3d   :  { %v81_v15 = vrot.slane %v80_v13, 4 }
  0x3e   :  { %v188_v56 = vsub.s32 2, %v630_v54  ;;  %v271_v57 = vsub.s32 7, %v630_v54  ;;  %v177_v58 = vsub.s32 1, %v630_v54  ;;  %v241_v59 = vsub.s32 6, %v630_v54  ;;  %p525_p10 = pnand %p524_p9, %p518_p6 }
  0x3f   :  { %v82_v16 = vmax.f32 %v80_v13, %v81_v15  ;;  %v199_v63 = vsub.s32 3, %v630_v54  ;;  %v210_v14 = vsub.s32 4, %v630_v54  ;;  %v221_v15 = vsub.s32 5, %v630_v54 }
  0x40   :  { %410 = vset.pattern.permute.xlu1 %v559_v17  ;;  %411 = vset.pattern.permute.xlu0 %v560_v18  ;;  %v263_v2 = vrot.slane %v158_v60, %v188_v56  ;;  %v233_v4 = vrot.slane %v158_v60, %v177_v58  ;;  %v242_v5 = vrot.slane %v636_v61, %v241_v59 }
  0x41   :  { %v83_v19 = vrot.slane %v82_v16, 2  ;;  %289 = vperm.xlu1 %410, %v611_v3   ;;  %298 = vperm.xlu0 %411, %v611_v3   ;;  %v189_v52 = vrot.slane %v636_v61, %v188_v56  ;;  %v222_v56 = vrot.slane %v636_v61, %v221_v15 }
  0x43   :  { %v84_v20 = vmax.f32 %v82_v16, %v83_v19 }
  0x45   :  { %v85_v21 = vrot.slane %v84_v20, 1  ;;  %412 = vset.pattern.permute.xlu1 %v561_v22  ;;  %414 = vset.pattern.permute.xlu0 %v562_v23 }
  0x46   :  { %247 = vperm.xlu1 %412, %v611_v3   ;;  %310 = vperm.xlu0 %414, %v611_v3  }
  0x47   :  { %v86_v24 = vmax.f32 %v84_v20, %v85_v21  ;;  %v253_v21 = vrot.slane %v158_v60, %v210_v14 }
  0x49   :  { %v89_v25 = vsub.f32 %v365_v8, %v86_v24  ;;  %v90_v26 = vsub.f32 %v366_v9, %v86_v24  ;;  %v87_v27 = vsub.f32 %v361_v6, %v86_v24  ;;  %v88_v28 = vsub.f32 %v362_v7, %v86_v24 }
  0x4a   :  { %413 = vset.pattern.permute.xlu1 %v563_v29  ;;  %417 = vset.pattern.permute.xlu0 %v564_v30  ;;  %v295_v6 = vrot.slane %v158_v60, %v199_v63  ;;  %v316_v29 = vrot.slane %v158_v60, %v241_v59 }
  0x4b   :  { %v95_v31 = vmul.f32 1.442695, %v89_v25  ;;  %v97_v32 = vmul.f32 1.442695, %v90_v26  ;;  %v91_v33 = vmul.f32 1.442695, %v87_v27  ;;  %278 = vperm.xlu1 %413, %v611_v3   ;;  %172 = vperm.xlu0 %417, %v611_v3   ;;  %v284_v25 = vrot.slane %v158_v60, %v221_v15 }
  0x4c   :  { %v93_v34 = vmul.f32 1.442695, %v88_v28  ;;  %v327_v28 = vrot.slane %v158_v60, %v271_v57 }
  0x4d   :  { %423 = vpow2.f32 %v95_v31 }
  0x4e   :  { %425 = vpow2.f32 %v97_v32 }
  0x4f   :  { %427 = vpow2.f32 %v91_v33  ;;  %415 = vset.pattern.permute.xlu1 %v565_v35  ;;  %420 = vset.pattern.permute.xlu0 %v566_v36 }
  0x50   :  { %429 = vpow2.f32 %v93_v34  ;;  %321 = vperm.xlu1 %415, %v611_v3   ;;  %205 = vperm.xlu0 %420, %v611_v3  }
  0x54   :  { %416 = vset.pattern.permute.xlu1 %v567_v37  ;;  %422 = vset.pattern.permute.xlu0 %v565_v35 }
  0x55   :  { %162 = vperm.xlu1 %416, %v611_v3  }
  0x59   :  { %418 = vset.pattern.permute.xlu1 %v568_v38 }
  0x5a   :  { %v424_v39 = vpop.eup %423  ;;  %183 = vperm.xlu1 %418, %v611_v3  }
  0x5b   :  { %v426_v40 = vpop.eup %425 }
  0x5c   :  { %v428_v41 = vpop.eup %427  ;;  %v111_v42 = vpack.c.bf16 %v426_v40, %v424_v39 }
  0x5d   :  { %v430_v43 = vpop.eup %429 }
  0x5e   :  { %372 = vmatpush3.bf16.msra.mxu0 %v111_v42  ;;  %v110_v44 = vpack.c.bf16 %v430_v43, %v428_v41  ;;  %419 = vset.pattern.permute.xlu1 %v569_v45  ;;  %v99_v48 = vadd.f32 %v430_v43, %v428_v41  ;;  %v178_v43 = vrot.slane %v636_v61, %v177_v58 }
  0x5f   :  { %373 = vmatprep.subr.bf16.mxu0 %v554_v1  ;;  %194 = vperm.xlu1 %419, %v611_v3   ;;  %v167_v1 = vsub.s32 0, %v630_v54 }
  0x60   :  { %v100_v49 = vadd.f32 %v424_v39, %v99_v48 }
  0x61   :  { %v304_v8 = vrot.slane %v158_v60, %v167_v1  ;;  %v168_v42 = vrot.slane %v636_v61, %v167_v1 }
  0x62   :  { %374 = vmatpush3.bf16.msra.mxu0 %v110_v44  ;;  %v101_v50 = vadd.f32 %v426_v40, %v100_v49 }
  0x63   :  { %421 = vset.pattern.permute.xlu1 %v570_v47 }
  0x64   :  { %216 = vperm.xlu1 %421, %v611_v3   ;;  %v272_v3 = vrot.slane %v636_v61, %v271_v57  ;;  %v102_v26 = vrot.slane %v101_v50, 4 }
  0x65   :  { %376 = vmatmul.mubr.msk.bf16.vlgmr.msra.gmra.mxu0 %vm112_vm1, %v109_v46 }
  0x66   :  { %v103_v35 = vadd.f32 %v102_v26, %v101_v50 }
  0x68   :  { %v104_v44 = vrot.slane %v103_v35, 2 }
  0xb2   :  { %v258_v51 = vpop.permute.xlu1 %257  ;;  %v228_v55 = vpop.permute.xlu0 %227 }
  0xb3   :  { %v264_v9 = vmin.f32 %v258_v51, %v263_v2  ;;  %v234_v11 = vmin.f32 %v228_v55, %v233_v4  ;;  %v200_v55 = vrot.slane %v636_v61, %v199_v63 }
  0xb7   :  { %v267_v53 = vpop.permute.xlu1 %266  ;;  %v237_v0 = vpop.permute.xlu0 %236 }
  0xb8   :  { %v273_v10 = vmax.f32 %v267_v53, %v272_v3  ;;  %v243_v12 = vmax.f32 %v237_v0, %v242_v5  ;;  %v105_v53 = vadd.f32 %v104_v44, %v103_v35  ;;  %v211_v0 = vrot.slane %v636_v61, %v210_v14 }
  0xba   :  { %v274_v16 = vsub.f32 %v264_v9, %v273_v10  ;;  %v244_v18 = vsub.f32 %v234_v11, %v243_v12 }
  0xbc   :  { %v290_v62 = vpop.permute.xlu1 %289  ;;  %v299_v13 = vpop.permute.xlu0 %298  ;;  %v275_v22 = vmax.f32 %v274_v16, 0.0  ;;  %v245_v23 = vmax.f32 %v244_v18, 0.0 }
  0xbd   :  { %v296_v17 = vmin.f32 %v290_v62, %v295_v6  ;;  %v305_v19 = vmax.f32 %v299_v13, %v304_v8  ;;  %v106_v62 = vrot.slane %v105_v53, 1 }
  0xbe   :  { %v276_v33 = vmul.f32 %v275_v22, %v245_v23 }
  0xbf   :  { %v306_v24 = vsub.f32 %v296_v17, %v305_v19  ;;  %v107_v4 = vadd.f32 %v106_v62, %v105_v53 }
  0xc1   :  { %v248_v7 = vpop.permute.xlu1 %247  ;;  %v307_v31 = vmax.f32 %v306_v24, 0.0  ;;  %v311_v34 = vpop.permute.xlu0 %310 }
  0xc2   :  { %v254_v30 = vadd.f32 %v253_v21, %v248_v7  ;;  %v317_v36 = vadd.f32 %v316_v29, %v311_v34 }
  0xc3   :  { %v308_v40 = vmul.f32 %v307_v31, %v276_v33 }
  0xc4   :  { %v255_v38 = vsub.f32 %v254_v30, %v244_v18  ;;  %v318_v48 = vsub.f32 %v317_v36, %v306_v24 }
  0xc6   :  { %v279_v20 = vpop.permute.xlu1 %278  ;;  %v173_v45 = vpop.permute.xlu0 %172 }
  0xc7   :  { %v285_v32 = vadd.f32 %v284_v25, %v279_v20  ;;  %v179_v50 = vsub.f32 %v173_v45, %v178_v43 }
  0xc9   :  { %v286_v39 = vsub.f32 %v285_v32, %v274_v16  ;;  %v180_v60 = vand.u32 2147483647, %v179_v50 }
  0xcb   :  { %v322_v27 = vpop.permute.xlu1 %321  ;;  %v287_v46 = vmul.f32 %v286_v39, %v255_v38  ;;  %v206_v5 = vpop.permute.xlu0 %205 }
  0xcc   :  { %v328_v41 = vadd.f32 %v327_v28, %v322_v27  ;;  %v212_v8 = vsub.f32 %v206_v5, %v211_v0 }
  0xcd   :  { %v319_v54 = vmul.f32 %v318_v48, %v287_v46 }
  0xce   :  { %v329_v47 = vsub.f32 %v328_v41, %v308_v40  ;;  %v213_v11 = vand.u32 2147483647, %v212_v8 }
  0xd0   :  { %v163_v37 = vpop.permute.xlu1 %162  ;;  %431 = vrcp.f32 %v329_v47 }
  0xd1   :  { %v169_v51 = vsub.f32 %v163_v37, %v168_v42  ;;  %433 = vrcp.f32 %v319_v54 }
  0xd2   :  { %435 = vrcp.f32 %v107_v4 }
  0xd3   :  { %v170_v57 = vand.u32 2147483647, %v169_v51 }
  0xd5   :  { %v184_v49 = vpop.permute.xlu1 %183  ;;  %v181_v2 = vadd.f32 %v180_v60, %v170_v57 }
  0xd6   :  { %v190_v59 = vsub.f32 %v184_v49, %v189_v52 }
  0xd8   :  { %v191_v1 = vand.u32 2147483647, %v190_v59 }
  0xda   :  { %v195_v58 = vpop.permute.xlu1 %194  ;;  %v192_v6 = vadd.f32 %v191_v1, %v181_v2 }
  0xdb   :  { %v201_v3 = vsub.f32 %v195_v58, %v200_v55 }
  0xdd   :  { %v202_v7 = vand.u32 2147483647, %v201_v3  ;;  %v432_v9 = vpop.eup %431 }
  0xde   :  { %v332_v13 = vmul.f32 %v432_v9, %v308_v40  ;;  %v434_v16 = vpop.eup %433 }
  0xdf   :  { %v217_v63 = vpop.permute.xlu1 %216  ;;  %v203_v10 = vadd.f32 %v202_v7, %v192_v6  ;;  %v334_v19 = vmul.f32 %v434_v16, %v329_v47  ;;  %v436_v21 = vpop.eup %435 }
  0xe0   :  { %v223_v12 = vsub.f32 %v217_v63, %v222_v56  ;;  %v333_v18 = vsub.f32 1.0, %v332_v13 }
  0xe1   :  { %v214_v17 = vadd.f32 %v213_v11, %v203_v10 }
  0xe2   :  { %v224_v14 = vand.u32 2147483647, %v223_v12  ;;  %v335_v22 = vsub.f32 %v333_v18, %v334_v19 }
  0xe4   :  { %v225_v20 = vadd.f32 %v224_v14, %v214_v17  ;;  %v338_v26 = vmul.f32 2.0, %v335_v22 }
  0xe6   :  { %v336_v61 = vmul.f32 5.0, %v225_v20 }
 0x125   :  { %v150_v23 = vpop.f32.mrf.mxu0 }
 0x126   :  { %v156_v15 = vmul.f32 %v436_v21, %v150_v23 }
 0x127   :  { %v377_v24 = vpop.f32.mrf.mxu0 }
 0x128   :  { %v337_v25 = vadd.f32 %v336_v61, %v156_v15 }
 0x129   :  { %v153_v27 = vpop.f32.mrf.mxu0 }
 0x12a   :  { %v339_v28 = vadd.f32 %v338_v26, %v337_v25 }
 0x12b   :  { %v378_v29 = vpop.f32.mrf.mxu0 }
 0x12c   :  { %340 = vst [vmem:[#allocation10] sm:$0xff] %v339_v28 }
 0x12d   :  { %528 = shalt.err (!%p525_p10)
}
 0x12e   :  { %350 = dma.vmem_to_hbm [thread:$0]  %s348_s3, 128, %s657_s4, [#allocation4]  }
 0x12f   :  { %543 = dma.done.wait [#allocation4], 128  }
 0x130   :  { %544 = vsyncadd [#allocation4], 4294967168 }
 0x131   :  { %354 = vsyncpa [#allocation3], 1 }
 0x132   :  { %355 = vsyncpa [#allocation6], 1 }
 0x133   :  { %356 = vsyncpa [#allocation9], 1 }
 0x134   :  { %357 = vsyncpa [#allocation4], 1 }

</bundles_post_ra>
